<compile_context>
chip_gen: v6e
topology: v6e:2x2x1
jax: 0.10.0
libtpu: 0.0.40
codegen_flags: <defaults>
</compile_context>

<pallas_src>
import functools

import jax
import jax.numpy as jnp
from jax import lax
from jax.experimental import pallas as pl
from jax.experimental.pallas import tpu as pltpu


def linear_attention_kernel(x_ref, wq_ref, bq_ref, wk_ref, bk_ref,
                            wv_ref, bv_ref, wp_ref, bp_ref, out_ref,
                            *, n_head):
    """One batch element per grid step; head-batched bf16 matmuls, f32 accum."""
    x = x_ref[...]                                              # (L, D) f32
    L, D = x.shape

    xb = x.astype(jnp.bfloat16)
    xh = jnp.broadcast_to(xb[None, :, :], (n_head, L, D))       # (H, L, D)

    # Per-head input projections: (H, L, D) @ (H, D, hd) -> (H, L, hd).
    q = jnp.einsum('hld,hde->hle', xh, wq_ref[...],
                   preferred_element_type=jnp.float32) + bq_ref[...]
    k = jnp.einsum('hld,hde->hle', xh, wk_ref[...],
                   preferred_element_type=jnp.float32) + bk_ref[...]
    v = jnp.einsum('hld,hde->hle', xh, wv_ref[...],
                   preferred_element_type=jnp.float32) + bv_ref[...]

    # Causal (diagonal-inclusive) mask, built once, broadcast over heads.
    row = lax.broadcasted_iota(jnp.int32, (L, L), 0)
    col = lax.broadcasted_iota(jnp.int32, (L, L), 1)
    causal = (row >= col)[None, :, :]                           # (1, L, L)

    # Linear attention: scores, causal zero-mask, accumulate V (no softmax).
    s = jnp.einsum('hld,hmd->hlm',
                   q.astype(jnp.bfloat16), k.astype(jnp.bfloat16),
                   preferred_element_type=jnp.float32)          # (H, L, L)
    s = jnp.where(causal, s, 0.0)
    y = jnp.einsum('hlm,hmd->hld',
                   s.astype(jnp.bfloat16), v.astype(jnp.bfloat16),
                   preferred_element_type=jnp.float32)          # (H, L, hd)

    # Output projection accumulated per head: out = sum_h Y_h @ Wp[h] + b.
    per_head = jnp.einsum('hld,hde->hle',
                          y.astype(jnp.bfloat16), wp_ref[...],
                          preferred_element_type=jnp.float32)   # (H, L, D)
    out = jnp.sum(per_head, axis=0) + bp_ref[...]               # (L, D)
    out_ref[...] = out.astype(out_ref.dtype)


def linear_attention(x, w_q, b_q, w_k, b_k, w_v, b_v, w_proj, b_proj, *, n_head):
    """Wrapper: pre-splits weights per head (pure JAX) and launches the kernel.

    All linear weights are stored pre-transposed as (in, out): y = x @ W + b.
    """
    B, L, D = x.shape
    assert D % n_head == 0
    hd = D // n_head

    # Head-split the weights OUTSIDE the kernel (cheap; avoids any in-kernel
    # reshape/transpose).  Input projections: columns grouped per head.
    def split_cols(w):                     # (D, D) -> (H, D, hd), bf16 for MXU
        return jnp.transpose(w.reshape(D, n_head, hd), (1, 0, 2)).astype(jnp.bfloat16)

    def split_bias(b):                     # (1, D) -> (H, 1, hd), keep f32
        return jnp.transpose(b.reshape(1, n_head, hd), (1, 0, 2)).astype(jnp.float32)

    wqh, wkh, wvh = split_cols(w_q), split_cols(w_k), split_cols(w_v)
    bqh, bkh, bvh = split_bias(b_q), split_bias(b_k), split_bias(b_v)
    # Projection: rows grouped per head: (D, D) -> (H, hd, D).
    wph = w_proj.reshape(n_head, hd, D).astype(jnp.bfloat16)
    bp = b_proj.astype(jnp.float32)

    kernel = functools.partial(linear_attention_kernel, n_head=n_head)
    return pl.pallas_call(
        kernel,
        out_shape=jax.ShapeDtypeStruct((B, L, D), x.dtype),
        grid=(B,),
        in_specs=[
            pl.BlockSpec((None, L, D), lambda b: (b, 0, 0)),     # x (per-batch slab)
            pl.BlockSpec((n_head, D, hd), lambda b: (0, 0, 0)),  # Wq per head
            pl.BlockSpec((n_head, 1, hd), lambda b: (0, 0, 0)),  # bq per head
            pl.BlockSpec((n_head, D, hd), lambda b: (0, 0, 0)),  # Wk per head
            pl.BlockSpec((n_head, 1, hd), lambda b: (0, 0, 0)),  # bk per head
            pl.BlockSpec((n_head, D, hd), lambda b: (0, 0, 0)),  # Wv per head
            pl.BlockSpec((n_head, 1, hd), lambda b: (0, 0, 0)),  # bv per head
            pl.BlockSpec((n_head, hd, D), lambda b: (0, 0, 0)),  # Wproj per head
            pl.BlockSpec((1, D), lambda b: (0, 0)),              # bproj
        ],
        out_specs=pl.BlockSpec((None, L, D), lambda b: (b, 0, 0)),
        compiler_params=pltpu.CompilerParams(
            dimension_semantics=("parallel",),
            vmem_limit_bytes=32 * 1024 * 1024,
        ),
    )(x, wqh, bqh, wkh, bkh, wvh, bvh, wph, bp)


def reference_forward(x, w_q, b_q, w_k, b_k, w_v, b_v, w_proj, b_proj, *, n_head):
    """Pure-JAX reference mirroring the PyTorch LinearAttention forward (eval)."""
    B, L, D = x.shape
    d = D // n_head
    Q = (x @ w_q + b_q).reshape(B, L, n_head, d)
    K = (x @ w_k + b_k).reshape(B, L, n_head, d)
    V = (x @ w_v + b_v).reshape(B, L, n_head, d)
    # W[b,l,h,d,e] = K[b,l,h,d] * V[b,l,h,e]; cumulative sum over the sequence.
    W = jnp.einsum('blhd,blhe->blhde', K, V)
    W = jnp.cumsum(W, axis=1)
    Y = jnp.einsum('blhd,blhde->blhe', Q, W).reshape(B, L, D)
    return Y @ w_proj + b_proj


if __name__ == "__main__":
    # config: n_embd=32, n_head=4, bias=True, dropout=0 (eval mode)
    B, L, D, n_head = 2, 8, 32, 4

    key = jax.random.PRNGKey(0)
    ks = jax.random.split(key, 9)
    w_q = jax.random.normal(ks[0], (D, D), jnp.float32) * 0.02
    b_q = jax.random.normal(ks[1], (1, D), jnp.float32) * 0.02
    w_k = jax.random.normal(ks[2], (D, D), jnp.float32) * 0.02
    b_k = jax.random.normal(ks[3], (1, D), jnp.float32) * 0.02
    w_v = jax.random.normal(ks[4], (D, D), jnp.float32) * 0.02
    b_v = jax.random.normal(ks[5], (1, D), jnp.float32) * 0.02
    w_proj = jax.random.normal(ks[6], (D, D), jnp.float32) * 0.02
    b_proj = jax.random.normal(ks[7], (1, D), jnp.float32) * 0.02
    x = jax.random.normal(ks[8], (B, L, D), jnp.float32)

    out = linear_attention(x, w_q, b_q, w_k, b_k, w_v, b_v, w_proj, b_proj,
                           n_head=n_head)
    out = jax.block_until_ready(out)

    with jax.default_matmul_precision("highest"):
        ref = reference_forward(x, w_q, b_q, w_k, b_k, w_v, b_v, w_proj, b_proj,
                                n_head=n_head)
    ref = jax.block_until_ready(ref)

    assert out.shape == (B, L, D)
    max_err = float(jnp.max(jnp.abs(out - ref)))
    # bf16 MXU operands with f32 accumulation -> loosened tolerance vs pure f32.
    assert jnp.allclose(out, ref, atol=2e-3, rtol=2e-2), (
        f"max abs err = {max_err}")
    print("KERNEL_OK")
</pallas_src>

<mosaic_0001>
module attributes {stable_mosaic.version = 11 : i64} {
  func.func @linear_attention_kernel(%arg0: i32, %arg1: memref<1x8x32xf32, #tpu.memory_space<vmem>>, %arg2: memref<4x32x8xbf16, #tpu.memory_space<vmem>>, %arg3: memref<4x1x8xf32, #tpu.memory_space<vmem>>, %arg4: memref<4x32x8xbf16, #tpu.memory_space<vmem>>, %arg5: memref<4x1x8xf32, #tpu.memory_space<vmem>>, %arg6: memref<4x32x8xbf16, #tpu.memory_space<vmem>>, %arg7: memref<4x1x8xf32, #tpu.memory_space<vmem>>, %arg8: memref<4x8x32xbf16, #tpu.memory_space<vmem>>, %arg9: memref<1x32xf32, #tpu.memory_space<vmem>>, %arg10: memref<1x8x32xf32, #tpu.memory_space<vmem>>) attributes {dimension_semantics = [#tpu.dimension_semantics<parallel>], iteration_bounds = array<i64: 2>, scalar_prefetch = 0 : i64, scratch_operands = 0 : i64, tpu.core_type = #tpu.core_type<tc>, window_params = [{transform_indices = @transform_0, window_bounds = array<i64: 1, 8, 32>}, {pipeline_mode = #tpu.pipeline_mode<synchronous>, transform_indices = @transform_1, window_bounds = array<i64: 4, 32, 8>}, {pipeline_mode = #tpu.pipeline_mode<synchronous>, transform_indices = @transform_2, window_bounds = array<i64: 4, 1, 8>}, {pipeline_mode = #tpu.pipeline_mode<synchronous>, transform_indices = @transform_3, window_bounds = array<i64: 4, 32, 8>}, {pipeline_mode = #tpu.pipeline_mode<synchronous>, transform_indices = @transform_4, window_bounds = array<i64: 4, 1, 8>}, {pipeline_mode = #tpu.pipeline_mode<synchronous>, transform_indices = @transform_5, window_bounds = array<i64: 4, 32, 8>}, {pipeline_mode = #tpu.pipeline_mode<synchronous>, transform_indices = @transform_6, window_bounds = array<i64: 4, 1, 8>}, {pipeline_mode = #tpu.pipeline_mode<synchronous>, transform_indices = @transform_7, window_bounds = array<i64: 4, 8, 32>}, {pipeline_mode = #tpu.pipeline_mode<synchronous>, transform_indices = @transform_8, window_bounds = array<i64: 1, 32>}, {transform_indices = @transform_9, window_bounds = array<i64: 1, 8, 32>}]} {
    %c0 = arith.constant 0 : index
    %c0_0 = arith.constant 0 : index
    %c0_1 = arith.constant 0 : index
    %0 = vector.load %arg1[%c0, %c0_0, %c0_1] : memref<1x8x32xf32, #tpu.memory_space<vmem>>, vector<1x8x32xf32>
    %1 = vector.shape_cast %0 : vector<1x8x32xf32> to vector<8x32xf32>
    %2 = arith.truncf %1 : vector<8x32xf32> to vector<8x32xbf16>
    %3 = vector.shape_cast %2 : vector<8x32xbf16> to vector<1x8x32xbf16>
    %4 = vector.shape_cast %3 : vector<1x8x32xbf16> to vector<1x8x32xbf16>
    %5 = vector.broadcast %4 : vector<1x8x32xbf16> to vector<4x8x32xbf16>
    %c0_2 = arith.constant 0 : index
    %c0_3 = arith.constant 0 : index
    %c0_4 = arith.constant 0 : index
    %6 = vector.load %arg2[%c0_2, %c0_3, %c0_4] : memref<4x32x8xbf16, #tpu.memory_space<vmem>>, vector<4x32x8xbf16>
    "tpu.trace_start"() <{level = 10 : i32, message = "hld,hde->hle"}> : () -> ()
    %cst = arith.constant dense<0.000000e+00> : vector<4x8x8xf32>
    %7 = tpu.matmul %5, %6, %cst {dimension_numbers = #tpu.dot_dimension_numbers<[2], [1], [1], [2], [0, 0, 0, 1, 1, 2], [0], [0]>} : vector<4x8x32xbf16>, vector<4x32x8xbf16>, vector<4x8x8xf32> -> vector<4x8x8xf32>
    "tpu.trace_stop"() : () -> ()
    %c0_5 = arith.constant 0 : index
    %c0_6 = arith.constant 0 : index
    %c0_7 = arith.constant 0 : index
    %8 = vector.load %arg3[%c0_5, %c0_6, %c0_7] : memref<4x1x8xf32, #tpu.memory_space<vmem>>, vector<4x1x8xf32>
    %9 = vector.broadcast %8 : vector<4x1x8xf32> to vector<4x8x8xf32>
    %10 = arith.addf %7, %9 : vector<4x8x8xf32>
    %c0_8 = arith.constant 0 : index
    %c0_9 = arith.constant 0 : index
    %c0_10 = arith.constant 0 : index
    %11 = vector.load %arg4[%c0_8, %c0_9, %c0_10] : memref<4x32x8xbf16, #tpu.memory_space<vmem>>, vector<4x32x8xbf16>
    "tpu.trace_start"() <{level = 10 : i32, message = "hld,hde->hle"}> : () -> ()
    %cst_11 = arith.constant dense<0.000000e+00> : vector<4x8x8xf32>
    %12 = tpu.matmul %5, %11, %cst_11 {dimension_numbers = #tpu.dot_dimension_numbers<[2], [1], [1], [2], [0, 0, 0, 1, 1, 2], [0], [0]>} : vector<4x8x32xbf16>, vector<4x32x8xbf16>, vector<4x8x8xf32> -> vector<4x8x8xf32>
    "tpu.trace_stop"() : () -> ()
    %c0_12 = arith.constant 0 : index
    %c0_13 = arith.constant 0 : index
    %c0_14 = arith.constant 0 : index
    %13 = vector.load %arg5[%c0_12, %c0_13, %c0_14] : memref<4x1x8xf32, #tpu.memory_space<vmem>>, vector<4x1x8xf32>
    %14 = vector.broadcast %13 : vector<4x1x8xf32> to vector<4x8x8xf32>
    %15 = arith.addf %12, %14 : vector<4x8x8xf32>
    %c0_15 = arith.constant 0 : index
    %c0_16 = arith.constant 0 : index
    %c0_17 = arith.constant 0 : index
    %16 = vector.load %arg6[%c0_15, %c0_16, %c0_17] : memref<4x32x8xbf16, #tpu.memory_space<vmem>>, vector<4x32x8xbf16>
    "tpu.trace_start"() <{level = 10 : i32, message = "hld,hde->hle"}> : () -> ()
    %cst_18 = arith.constant dense<0.000000e+00> : vector<4x8x8xf32>
    %17 = tpu.matmul %5, %16, %cst_18 {dimension_numbers = #tpu.dot_dimension_numbers<[2], [1], [1], [2], [0, 0, 0, 1, 1, 2], [0], [0]>} : vector<4x8x32xbf16>, vector<4x32x8xbf16>, vector<4x8x8xf32> -> vector<4x8x8xf32>
    "tpu.trace_stop"() : () -> ()
    %c0_19 = arith.constant 0 : index
    %c0_20 = arith.constant 0 : index
    %c0_21 = arith.constant 0 : index
    %18 = vector.load %arg7[%c0_19, %c0_20, %c0_21] : memref<4x1x8xf32, #tpu.memory_space<vmem>>, vector<4x1x8xf32>
    %19 = vector.broadcast %18 : vector<4x1x8xf32> to vector<4x8x8xf32>
    %20 = arith.addf %17, %19 : vector<4x8x8xf32>
    %21 = tpu.iota {dimensions = array<i32: 0>} : vector<8x8xi32>
    %22 = tpu.iota {dimensions = array<i32: 1>} : vector<8x8xi32>
    %23 = arith.cmpi sge, %21, %22 : vector<8x8xi32>
    %24 = vector.shape_cast %23 : vector<8x8xi1> to vector<1x8x8xi1>
    %25 = arith.truncf %10 : vector<4x8x8xf32> to vector<4x8x8xbf16>
    %26 = arith.truncf %15 : vector<4x8x8xf32> to vector<4x8x8xbf16>
    "tpu.trace_start"() <{level = 10 : i32, message = "hld,hmd->hlm"}> : () -> ()
    %cst_22 = arith.constant dense<0.000000e+00> : vector<4x8x8xf32>
    %27 = tpu.matmul %25, %26, %cst_22 {dimension_numbers = #tpu.dot_dimension_numbers<[2], [2], [1], [1], [0, 0, 0, 1, 1, 1], [0], [0]>} : vector<4x8x8xbf16>, vector<4x8x8xbf16>, vector<4x8x8xf32> -> vector<4x8x8xf32>
    %cst_23 = arith.constant 0.000000e+00 : f32
    "tpu.trace_stop"() : () -> ()
    %28 = vector.shape_cast %24 : vector<1x8x8xi1> to vector<1x8x8xi1>
    %29 = vector.broadcast %28 : vector<1x8x8xi1> to vector<4x8x8xi1>
    %30 = vector.broadcast %cst_23 : f32 to vector<4x8x8xf32>
    %31 = arith.select %29, %27, %30 : vector<4x8x8xi1>, vector<4x8x8xf32>
    %32 = arith.truncf %31 : vector<4x8x8xf32> to vector<4x8x8xbf16>
    %33 = arith.truncf %20 : vector<4x8x8xf32> to vector<4x8x8xbf16>
    "tpu.trace_start"() <{level = 10 : i32, message = "hlm,hmd->hld"}> : () -> ()
    %cst_24 = arith.constant dense<0.000000e+00> : vector<4x8x8xf32>
    %34 = tpu.matmul %32, %33, %cst_24 {dimension_numbers = #tpu.dot_dimension_numbers<[2], [1], [1], [2], [0, 0, 0, 1, 1, 2], [0], [0]>} : vector<4x8x8xbf16>, vector<4x8x8xbf16>, vector<4x8x8xf32> -> vector<4x8x8xf32>
    "tpu.trace_stop"() : () -> ()
    %35 = arith.truncf %34 : vector<4x8x8xf32> to vector<4x8x8xbf16>
    %c0_25 = arith.constant 0 : index
    %c0_26 = arith.constant 0 : index
    %c0_27 = arith.constant 0 : index
    %36 = vector.load %arg8[%c0_25, %c0_26, %c0_27] : memref<4x8x32xbf16, #tpu.memory_space<vmem>>, vector<4x8x32xbf16>
    "tpu.trace_start"() <{level = 10 : i32, message = "hld,hde->hle"}> : () -> ()
    %cst_28 = arith.constant dense<0.000000e+00> : vector<4x8x32xf32>
    %37 = tpu.matmul %35, %36, %cst_28 {dimension_numbers = #tpu.dot_dimension_numbers<[2], [1], [1], [2], [0, 0, 0, 1, 1, 2], [0], [0]>} : vector<4x8x8xbf16>, vector<4x8x32xbf16>, vector<4x8x32xf32> -> vector<4x8x32xf32>
    "tpu.trace_stop"() : () -> ()
    %cst_29 = arith.constant dense<0.000000e+00> : vector<8x32xf32>
    %38 = vector.multi_reduction <add>, %37, %cst_29 [0] : vector<4x8x32xf32> to vector<8x32xf32>
    %c0_30 = arith.constant 0 : index
    %c0_31 = arith.constant 0 : index
    %39 = vector.load %arg9[%c0_30, %c0_31] : memref<1x32xf32, #tpu.memory_space<vmem>>, vector<1x32xf32>
    %40 = vector.broadcast %39 : vector<1x32xf32> to vector<8x32xf32>
    %41 = arith.addf %38, %40 : vector<8x32xf32>
    %c0_32 = arith.constant 0 : index
    %c0_33 = arith.constant 0 : index
    %c0_34 = arith.constant 0 : index
    %42 = vector.load %arg10[%c0_32, %c0_33, %c0_34] : memref<1x8x32xf32, #tpu.memory_space<vmem>>, vector<1x8x32xf32>
    %43 = vector.shape_cast %42 : vector<1x8x32xf32> to vector<8x32xf32>
    %44 = vector.shape_cast %41 : vector<8x32xf32> to vector<1x8x32xf32>
    tpu.vector_store %arg10[%c0_32, %c0_33, %c0_34], %44 {strides = array<i32>} : memref<1x8x32xf32, #tpu.memory_space<vmem>>, vector<1x8x32xf32>,
    return
  }
  func.func @transform_0(%arg0: i32) -> (i32, i32, i32) {
    %c0_i32 = arith.constant 0 : i32
    %c0_i32_0 = arith.constant 0 : i32
    %c0_i32_1 = arith.constant 0 : i32
    return %arg0, %c0_i32, %c0_i32_0 : i32, i32, i32
  }
  func.func @transform_1(%arg0: i32) -> (i32, i32, i32) {
    %c0_i32 = arith.constant 0 : i32
    %c0_i32_0 = arith.constant 0 : i32
    %c0_i32_1 = arith.constant 0 : i32
    %c0_i32_2 = arith.constant 0 : i32
    return %c0_i32, %c0_i32_0, %c0_i32_1 : i32, i32, i32
  }
  func.func @transform_2(%arg0: i32) -> (i32, i32, i32) {
    %c0_i32 = arith.constant 0 : i32
    %c0_i32_0 = arith.constant 0 : i32
    %c0_i32_1 = arith.constant 0 : i32
    %c0_i32_2 = arith.constant 0 : i32
    return %c0_i32, %c0_i32_0, %c0_i32_1 : i32, i32, i32
  }
  func.func @transform_3(%arg0: i32) -> (i32, i32, i32) {
    %c0_i32 = arith.constant 0 : i32
    %c0_i32_0 = arith.constant 0 : i32
    %c0_i32_1 = arith.constant 0 : i32
    %c0_i32_2 = arith.constant 0 : i32
    return %c0_i32, %c0_i32_0, %c0_i32_1 : i32, i32, i32
  }
  func.func @transform_4(%arg0: i32) -> (i32, i32, i32) {
    %c0_i32 = arith.constant 0 : i32
    %c0_i32_0 = arith.constant 0 : i32
    %c0_i32_1 = arith.constant 0 : i32
    %c0_i32_2 = arith.constant 0 : i32
    return %c0_i32, %c0_i32_0, %c0_i32_1 : i32, i32, i32
  }
  func.func @transform_5(%arg0: i32) -> (i32, i32, i32) {
    %c0_i32 = arith.constant 0 : i32
    %c0_i32_0 = arith.constant 0 : i32
    %c0_i32_1 = arith.constant 0 : i32
    %c0_i32_2 = arith.constant 0 : i32
    return %c0_i32, %c0_i32_0, %c0_i32_1 : i32, i32, i32
  }
  func.func @transform_6(%arg0: i32) -> (i32, i32, i32) {
    %c0_i32 = arith.constant 0 : i32
    %c0_i32_0 = arith.constant 0 : i32
    %c0_i32_1 = arith.constant 0 : i32
    %c0_i32_2 = arith.constant 0 : i32
    return %c0_i32, %c0_i32_0, %c0_i32_1 : i32, i32, i32
  }
  func.func @transform_7(%arg0: i32) -> (i32, i32, i32) {
    %c0_i32 = arith.constant 0 : i32
    %c0_i32_0 = arith.constant 0 : i32
    %c0_i32_1 = arith.constant 0 : i32
    %c0_i32_2 = arith.constant 0 : i32
    return %c0_i32, %c0_i32_0, %c0_i32_1 : i32, i32, i32
  }
  func.func @transform_8(%arg0: i32) -> (i32, i32) {
    %c0_i32 = arith.constant 0 : i32
    %c0_i32_0 = arith.constant 0 : i32
    %c0_i32_1 = arith.constant 0 : i32
    return %c0_i32, %c0_i32_0 : i32, i32
  }
  func.func @transform_9(%arg0: i32) -> (i32, i32, i32) {
    %c0_i32 = arith.constant 0 : i32
    %c0_i32_0 = arith.constant 0 : i32
    %c0_i32_1 = arith.constant 0 : i32
    return %arg0, %c0_i32, %c0_i32_0 : i32, i32, i32
  }
}

</mosaic_0001>

<bundles_post_ra>
// kernel: tpu_custom_call.1
= control target key start
LH: loop header
LB: loop body
LE: loop exit
PB: predicated region body
PF: predicated region fallthrough
CT: control target
= control target key end

     0   :  { %14 = vsyncpa [#allocation3], 0  ;;  %s2601_s0 = inlined_call_operand.vmem [shape: f32[2,8,32], index: 0, kind: input, shape index: {}]   ;;  %s2602_s1 = inlined_call_operand.vmem [shape: bf16[4,32,8], index: 1, kind: input, shape index: {}]   ;;  %s2603_s2 = inlined_call_operand.vmem [shape: f32[4,1,8], index: 2, kind: input, shape index: {}]   ;;  %s2604_s3 = inlined_call_operand.vmem [shape: bf16[4,32,8], index: 3, kind: input, shape index: {}]   ;;  %s2605_s4 = inlined_call_operand.vmem [shape: f32[4,1,8], index: 4, kind: input, shape index: {}]   ;;  %s2606_s5 = inlined_call_operand.vmem [shape: bf16[4,32,8], index: 5, kind: input, shape index: {}]   ;;  %s2607_s6 = inlined_call_operand.vmem [shape: f32[4,1,8], index: 6, kind: input, shape index: {}]   ;;  %s2608_s7 = inlined_call_operand.vmem [shape: bf16[4,8,32], index: 7, kind: input, shape index: {}]   ;;  %s2609_s8 = inlined_call_operand.vmem [shape: f32[1,32], index: 8, kind: input, shape index: {}]   ;;  %s2610_s9 = inlined_call_operand.hbm [shape: f32[2,8,32], index: 9, kind: output, shape index: {}]  }
   0x1   :  { %16 = vsyncpa [#allocation3 + $0x1], 0  ;;  %s2248_s30 = smov 0   ;;  %s2250_s10 = smov 0  }
   0x2   :  { %s2252_s11 = smov 0   ;;  %s2254_s12 = smov 0  }
   0x3 LB: > { %s2269_s13 = sadd.s32 4294967295, %s2193_s12   ;;  %s1769_s14 = sadd.s32 4294967294, %s2193_s12   ;;  %s2193_s12 = sphi %s2254_s12, %s2616_s12   ;;  %s2189_s11 = sphi %s2252_s11, %s2615_s11   ;;  %s2185_s10 = sphi %s2250_s10, %s2614_s10   ;;  %s2181_s30 = sphi %s2248_s30, %s2613_s30  }
   0x4   : > { %s2273_s15 = sadd.s32 1, %s2193_s12   ;;  %s223_s16 = sadd.s32 1, %s2189_s11 }
   0x5   : > { %s220_s17 = ssub.s32 %s2193_s12, %s2273_s15  ;;  %p233_p0 = scmp.ne.s32.totalorder %s2189_s11, %s2185_s10 }
   0x6   : > { %p221_p1 = scmp.eq.s32.totalorder %s220_s17, 0  ;;  %p234_p2 = scmp.eq.s32.totalorder %s2269_s13, 1 }
   0x7   : > { %p239_p3 = scmp.ne.s32.totalorder %s2185_s10, %s2181_s30  ;;  %p240_p4 = scmp.eq.s32.totalorder %s1769_s14, 1 }
   0x8   : > { %s2284_s18 = scalar_select %p221_p1, %s2189_s11, %s223_s16  }
   0x9   : > { %p2286_p5 = por %p234_p2, %p233_p0  ;;  %p2290_p6 = por %p240_p4, %p239_p3 }
   0xa   : > { %p1772_p7 = scmp.ge.s32.totalorder %s2193_s12, 1  ;;  %p289_p8 = scmp.lt.s32.totalorder %s2193_s12, 3 }
   0xc   : > { %p290_p9 = pnand %p1772_p7, %p289_p8 }
   0xd   : > { %p324_p10 = scmp.lt.s32.totalorder (!%p290_p9), %s2269_s13, 1  ;;  %s321_s22 = sand.u32 (!%p290_p9), 1, %s2185_s10  }
   0xe   : > { %293 = sbr.rel (%p290_p9) target bundleno = 861 (0x35d), region = 56  ;;  %s1837_s26 = sshll.u32 (!%p290_p9), %s2269_s13, 7 }
   0xf   : > { %s1708_s16 = scalar_lea.hbm (!%p290_p9), %s2610_s9, %s1837_s26  ;;  %s1697_s17 = scalar_lea.sflag (!%p290_p9), [#allocation3], %s321_s22 }
  0x13   : > { %v2109_v0 = vld [vmem:[%s2602_s1 + $0x8] sm:$0xff]   ;;  %v2195_v1 = vmov 0.0   ;;  %v2110_v2 = vld [vmem:[%s2602_s1 + $0x18] sm:$0xff]   ;;  %v2111_v3 = vld [vmem:[%s2602_s1] sm:$0xff]   ;;  %vm2196_vm0 = vmmov 0   ;;  %s325_s29 = scalar_select %p324_p10, %s2269_s13, 1 }
  0x14   : > { %1900 = vmatprep.subr.bf16.mxu0 %v2195_v1  ;;  %1908 = vmatprep.subr.bf16.mxu1 %v2195_v1  ;;  %v2112_v4 = vld [vmem:[%s2602_s1 + $0x10] sm:$0xff]   ;;  %v2113_v5 = vld [vmem:[%s2602_s1 + $0x28] sm:$0xff]   ;;  %v2114_v6 = vld [vmem:[%s2602_s1 + $0x38] sm:$0xff]   ;;  %vm387_vm1 = vcmask 261120   ;;  %vm1104_vm2 = vcmask 64512   ;;  %vm1306_vm3 = vcmask 1043456  }
  0x15   : > { %1901 = vmatpush3.bf16.msra.mxu0 %v2109_v0  ;;  %1904 = vmatprep.mubr.msk.bf16.mxu0 %vm2196_vm0, %v2195_v1  ;;  %s1774_s14 = sshll.u32 %s325_s29, 3  ;;  %v2115_v9 = vld [vmem:[%s2602_s1 + $0x20] sm:$0xff]   ;;  %v2116_v10 = vld [vmem:[%s2602_s1 + $0x30] sm:$0xff]   ;;  %v2117_v11 = vld [vmem:[%s2604_s3 + $0x8] sm:$0xff]   ;;  %s2197_s13 = smov [#allocation2]  }
  0x16   : > { %1909 = vmatpush3.bf16.msra.mxu1 %v2110_v2  ;;  %1902 = vmatprep.subr.bf16.mxu0 %v2195_v1  ;;  %s327_s23 = scalar_lea.vmem %s2601_s0, %s1774_s14  ;;  %v2118_v12 = vld [vmem:[%s2604_s3 + $0x18] sm:$0xff]   ;;  %v2119_v13 = vld [vmem:[%s2604_s3] sm:$0xff]   ;;  %v2120_v14 = vld [vmem:[%s2604_s3 + $0x10] sm:$0xff]  }
  0x17   : > { %1910 = vmatprep.subr.bf16.mxu1 %v2195_v1  ;;  %1912 = vmatprep.mubr.msk.bf16.mxu1 %vm2196_vm0, %v2195_v1  ;;  %v329_v7 = vld [vmem:[%s327_s23] sm:$0xff]  ;;  %v2121_v15 = vld [vmem:[%s2604_s3 + $0x28] sm:$0xff]   ;;  %v2122_v16 = vld [vmem:[%s2604_s3 + $0x38] sm:$0xff]   ;;  %s1773_s23 = sshll.u32 %s321_s22, 3 }
  0x18   : > { %v2329_v8 = vpack.c.bf16 %v329_v7, %v329_v7  ;;  %v2123_v17 = vld [vmem:[%s2604_s3 + $0x20] sm:$0xff]   ;;  %v2124_v18 = vld [vmem:[%s2604_s3 + $0x30] sm:$0xff]   ;;  %v2125_v19 = vld [vmem:[%s2606_s5 + $0x8] sm:$0xff]   ;;  %s323_s27 = scalar_lea.vmem [#allocation2], %s1773_s23  ;;  %s2137_s23 = sshll.u32 %s2197_s13, 4  ;;  %s2138_s23 = int_to_ptr.vmem [resolvable:$false] %s2137_s23 }
  0x19   : > { %1903 = vmatpush3.bf16.msra.mxu0 %v2111_v3  ;;  %v2126_v20 = vld [vmem:[%s2606_s5 + $0x18] sm:$0xff]   ;;  %v2127_v21 = vld [vmem:[%s2606_s5] sm:$0xff]   ;;  %v2128_v22 = vld [vmem:[%s2606_s5 + $0x10] sm:$0xff]   ;;  %s1710_s28 = sshll.u32 %s323_s27, 4  ;;  %s2139_s24 = scalar_lea.vmem %s2138_s23, 256  ;;  %s1711_s28 = int_to_ptr.vmem [resolvable:$true] %s1710_s28 }
  0x1a   : > { %1911 = vmatpush3.bf16.msra.mxu1 %v2112_v4  ;;  %1916 = vmatprep.subr.bf16.mxu0 %v2195_v1  ;;  %v2129_v23 = vld [vmem:[%s2606_s5 + $0x28] sm:$0xff]   ;;  %v2130_v24 = vld [vmem:[%s2606_s5 + $0x38] sm:$0xff]   ;;  %v2131_v25 = vld [vmem:[%s2606_s5 + $0x20] sm:$0xff]   ;;  %s2133_s21 = scalar_lea.vmem %s1711_s28, 128  ;;  %p2140_p0 = scmp.lt.s32.totalorder %s1711_s28, %s2138_s23 }
  0x1b   : > { %1924 = vmatprep.subr.bf16.mxu1 %v2195_v1  ;;  %v2132_v26 = vld [vmem:[%s2606_s5 + $0x30] sm:$0xff]   ;;  %v1791_v43 = vld [vmem:[%s2605_s4] ss:$0 sm:$0xff]  ;;  %v1792_v44 = vld [vmem:[%s2605_s4 + $0x1] ss:$0 sm:$0xff]  ;;  %p2134_p11 = scmp.ne.s32.totalorder %s1711_s28, %s2133_s21  ;;  %p2141_p1 = scmp.lt.s32.totalorder %s2139_s24, %s2133_s21 }
  0x1c   : > { %1905 = vmatmul.mubr.msk.bf16.vlgmr.msra.gmra.mxu0 %vm387_vm1, %v2329_v8  ;;  %v1775_v53 = vld [vmem:[%s2603_s2] ss:$0 sm:$0xff]  ;;  %v1776_v54 = vld [vmem:[%s2603_s2 + $0x1] ss:$0 sm:$0xff]  ;;  %v1793_v61 = vld [vmem:[%s2605_s4 + $0x2] ss:$0 sm:$0xff] }
  0x1d   : > { %1913 = vmatmul.mubr.msk.bf16.vlgmr.msra.gmra.mxu1 %vm387_vm1, %v2329_v8  ;;  %1917 = vmatpush3.bf16.msra.mxu0 %v2113_v5  ;;  %v1794_v62 = vld [vmem:[%s2605_s4 + $0x3] ss:$0 sm:$0xff]  ;;  %p2135_p12 = pnand %p2134_p11, %p2286_p5  ;;  %p2142_p2 = por %p2141_p1, %p2140_p0 }
  0x1e   : > { %1925 = vmatpush3.bf16.msra.mxu1 %v2114_v6  ;;  %1918 = vmatprep.subr.bf16.mxu0 %v2195_v1 }
  0x1f   : > { %1926 = vmatprep.subr.bf16.mxu1 %v2195_v1  ;;  %1920 = vmatprep.mubr.msk.bf16.mxu0 %vm2196_vm0, %v2195_v1  ;;  %p2136_p13 = pneg %p2135_p12 }
  0x20   : > { %1928 = vmatprep.mubr.msk.bf16.mxu1 %vm2196_vm0, %v2195_v1 }
  0x21   : > { %1919 = vmatpush3.bf16.msra.mxu0 %v2115_v9  ;;  %p2143_p3 = pnand %p2142_p2, %p2136_p13 }
  0x22   : > { %1927 = vmatpush3.bf16.msra.mxu1 %v2116_v10  ;;  %1932 = vmatprep.subr.bf16.mxu0 %v2195_v1 }
  0x23   : > { %1940 = vmatprep.subr.bf16.mxu1 %v2195_v1 }
  0x24   : > { %1921 = vmatmul.mubr.msk.bf16.vlgmr.msra.gmra.mxu0 %vm387_vm1, %v2329_v8 }
  0x25   : > { %1929 = vmatmul.mubr.msk.bf16.vlgmr.msra.gmra.mxu1 %vm387_vm1, %v2329_v8  ;;  %1933 = vmatpush3.bf16.msra.mxu0 %v2117_v11 }
  0x26   : > { %1941 = vmatpush3.bf16.msra.mxu1 %v2118_v12  ;;  %1934 = vmatprep.subr.bf16.mxu0 %v2195_v1  ;;  %v1777_v12 = vld [vmem:[%s2603_s2 + $0x2] ss:$0 sm:$0xff] }
  0x27   : > { %1942 = vmatprep.subr.bf16.mxu1 %v2195_v1  ;;  %1936 = vmatprep.mubr.msk.bf16.mxu0 %vm2196_vm0, %v2195_v1 }
  0x28   : > { %1944 = vmatprep.mubr.msk.bf16.mxu1 %vm2196_vm0, %v2195_v1 }
  0x29   : > { %1935 = vmatpush3.bf16.msra.mxu0 %v2119_v13  ;;  %v1778_v13 = vld [vmem:[%s2603_s2 + $0x3] ss:$0 sm:$0xff] }
  0x2a   : > { %1943 = vmatpush3.bf16.msra.mxu1 %v2120_v14  ;;  %1948 = vmatprep.subr.bf16.mxu0 %v2195_v1 }
  0x2b   : > { %1956 = vmatprep.subr.bf16.mxu1 %v2195_v1 }
  0x2c   : > { %1937 = vmatmul.mubr.msk.bf16.vlgmr.msra.gmra.mxu0 %vm387_vm1, %v2329_v8 }
  0x2d   : > { %1945 = vmatmul.mubr.msk.bf16.vlgmr.msra.gmra.mxu1 %vm387_vm1, %v2329_v8  ;;  %1949 = vmatpush3.bf16.msra.mxu0 %v2121_v15 }
  0x2e   : > { %1957 = vmatpush3.bf16.msra.mxu1 %v2122_v16  ;;  %1950 = vmatprep.subr.bf16.mxu0 %v2195_v1 }
  0x2f   : > { %1958 = vmatprep.subr.bf16.mxu1 %v2195_v1  ;;  %1952 = vmatprep.mubr.msk.bf16.mxu0 %vm2196_vm0, %v2195_v1 }
  0x30   : > { %1960 = vmatprep.mubr.msk.bf16.mxu1 %vm2196_vm0, %v2195_v1 }
  0x31   : > { %1951 = vmatpush3.bf16.msra.mxu0 %v2123_v17 }
  0x32   : > { %1959 = vmatpush3.bf16.msra.mxu1 %v2124_v18  ;;  %1964 = vmatprep.subr.bf16.mxu0 %v2195_v1 }
  0x33   : > { %1972 = vmatprep.subr.bf16.mxu1 %v2195_v1 }
  0x34   : > { %1953 = vmatmul.mubr.msk.bf16.vlgmr.msra.gmra.mxu0 %vm387_vm1, %v2329_v8 }
  0x35   : > { %1961 = vmatmul.mubr.msk.bf16.vlgmr.msra.gmra.mxu1 %vm387_vm1, %v2329_v8  ;;  %1968 = vmatprep.mubr.msk.bf16.mxu0 %vm2196_vm0, %v2195_v1 }
  0x36   : > { %1976 = vmatprep.mubr.msk.bf16.mxu1 %vm2196_vm0, %v2195_v1  ;;  %1965 = vmatpush3.bf16.msra.mxu0 %v2125_v19 }
  0x37   : > { %1966 = vmatprep.subr.bf16.mxu0 %v2195_v1  ;;  %1973 = vmatpush3.bf16.msra.mxu1 %v2126_v20 }
  0x38   : > { %1974 = vmatprep.subr.bf16.mxu1 %v2195_v1 }
  0x3a   : > { %1967 = vmatpush3.bf16.msra.mxu0 %v2127_v21 }
  0x3b   : > { %1980 = vmatprep.subr.bf16.mxu0 %v2195_v1  ;;  %1975 = vmatpush3.bf16.msra.mxu1 %v2128_v22 }
  0x3c   : > { %1988 = vmatprep.subr.bf16.mxu1 %v2195_v1 }
  0x3d   : > { %1969 = vmatmul.mubr.msk.bf16.vlgmr.msra.gmra.mxu0 %vm387_vm1, %v2329_v8 }
  0x3e   : > { %1981 = vmatpush3.bf16.msra.mxu0 %v2129_v23  ;;  %1984 = vmatprep.mubr.msk.bf16.mxu0 %vm2196_vm0, %v2195_v1 }
  0x3f   : > { %1977 = vmatmul.mubr.msk.bf16.vlgmr.msra.gmra.mxu1 %vm387_vm1, %v2329_v8  ;;  %1982 = vmatprep.subr.bf16.mxu0 %v2195_v1 }
  0x40   : > { %1989 = vmatpush3.bf16.msra.mxu1 %v2130_v24  ;;  %1992 = vmatprep.mubr.msk.bf16.mxu1 %vm2196_vm0, %v2195_v1  ;;  %v1807_v24 = vld [vmem:[%s2607_s6] ss:$0 sm:$0xff] }
  0x41   : > { %1990 = vmatprep.subr.bf16.mxu1 %v2195_v1 }
  0x42   : > { %1983 = vmatpush3.bf16.msra.mxu0 %v2131_v25 }
  0x43   : > { %1996 = vmatprep.subr.bf16.mxu0 %v2195_v1 }
  0x44   : > { %1991 = vmatpush3.bf16.msra.mxu1 %v2132_v26  ;;  %v1808_v26 = vld [vmem:[%s2607_s6 + $0x1] ss:$0 sm:$0xff] }
  0x45   : > { %1985 = vmatmul.mubr.msk.bf16.vlgmr.msra.gmra.mxu0 %vm387_vm1, %v2329_v8  ;;  %2002 = vmatprep.subr.bf16.mxu1 %v2195_v1 }
  0x46   : > { %1998 = vmatprep.mubr.msk.bf16.mxu0 %vm2196_vm0, %v2195_v1 }
  0x47   : > { %1993 = vmatmul.mubr.msk.bf16.vlgmr.msra.gmra.mxu1 %vm387_vm1, %v2329_v8 }
  0x48   : > { %2004 = vmatprep.mubr.msk.bf16.mxu1 %vm2196_vm0, %v2195_v1 }
  0xdc   : > { %v425_v27 = vpop.f32.mrf.mxu0 }
  0xdd   : > { %v477_v28 = vpop.f32.mrf.mxu1  ;;  %v426_v63 = vadd.f32 %v1775_v53, %v425_v27 }
  0xde   : > { %v1906_v29 = vpop.f32.mrf.mxu0  ;;  %v478_v0 = vadd.f32 %v1776_v54, %v477_v28 }
  0xdf   : > { %v1914_v30 = vpop.f32.mrf.mxu1  ;;  %v1096_v8 = vpack.c.bf16 %v426_v63, %v426_v63 }
  0xe0   : > { %v428_v31 = vpop.f32.mrf.mxu0  ;;  %v1097_v9 = vpack.c.bf16 %v478_v0, %v478_v0 }
  0xe1   : > { %v480_v32 = vpop.f32.mrf.mxu1 }
  0xe2   : > { %v1907_v33 = vpop.f32.mrf.mxu0 }
  0xe3   : > { %v1915_v34 = vpop.f32.mrf.mxu1 }
  0xe4   : > { %v529_v35 = vpop.f32.mrf.mxu0 }
  0xe5   : > { %v581_v36 = vpop.f32.mrf.mxu1  ;;  %v530_v20 = vadd.f32 %v1777_v12, %v529_v35 }
  0xe6   : > { %v1922_v37 = vpop.f32.mrf.mxu0  ;;  %v582_v21 = vadd.f32 %v1778_v13, %v581_v36 }
  0xe7   : > { %v1930_v38 = vpop.f32.mrf.mxu1  ;;  %v1098_v22 = vpack.c.bf16 %v530_v20, %v530_v20 }
  0xe8   : > { %v532_v39 = vpop.f32.mrf.mxu0  ;;  %v1099_v23 = vpack.c.bf16 %v582_v21, %v582_v21 }
  0xe9   : > { %v584_v40 = vpop.f32.mrf.mxu1 }
  0xea   : > { %v1923_v41 = vpop.f32.mrf.mxu0 }
  0xeb   : > { %v1931_v42 = vpop.f32.mrf.mxu1 }
  0xec   : > { %v677_v45 = vpop.f32.mrf.mxu0 }
  0xed   : > { %v729_v46 = vpop.f32.mrf.mxu1  ;;  %v678_v47 = vadd.f32 %v1791_v43, %v677_v45 }
  0xee   : > { %v730_v48 = vadd.f32 %v1792_v44, %v729_v46  ;;  %v1938_v49 = vpop.f32.mrf.mxu0 }
  0xef   : > { %v1946_v50 = vpop.f32.mrf.mxu1  ;;  %v1100_v51 = vpack.c.bf16 %v678_v47, %v678_v47  ;;  %v1809_v49 = vld [vmem:[%s2607_s6 + $0x2] ss:$0 sm:$0xff] }
  0xf0   : > { %v1101_v52 = vpack.c.bf16 %v730_v48, %v730_v48  ;;  %v680_v55 = vpop.f32.mrf.mxu0  ;;  %v1091_v48 = vlaneseq  ;;  %v1810_v50 = vld [vmem:[%s2607_s6 + $0x3] ss:$0 sm:$0xff] }
  0xf1   : > { %v732_v56 = vpop.f32.mrf.mxu1  ;;  %v1109_v57 = vsel %vm1104_vm2, %v1100_v51, 0 }
  0xf2   : > { %v1155_v58 = vsel %vm1104_vm2, %v1101_v52, 0  ;;  %v1939_v59 = vpop.f32.mrf.mxu0  ;;  %1997 = vmatpush3.bf16.xpose.msra.mxu0 %v1109_v57  ;;  %v1092_v51 = vshrl.u32 %v1091_v48, 7  ;;  %v1094_v52 = vand.u32 127, %v1091_v48 }
  0xf3   : > { %v1947_v60 = vpop.f32.mrf.mxu1  ;;  %2003 = vmatpush3.bf16.xpose.msra.mxu1 %v1155_v58  ;;  %2008 = vmatprep.subr.bf16.mxu0 %v2195_v1 }
  0xf4   : > { %2014 = vmatprep.subr.bf16.mxu1 %v2195_v1  ;;  %v781_v2 = vpop.f32.mrf.mxu0  ;;  %vm1095_vm4 = vcmp.ge.s32.totalorder %v1092_v51, %v1094_v52 }
  0xf5   : > { %v833_v3 = vpop.f32.mrf.mxu1  ;;  %v782_v4 = vadd.f32 %v1793_v61, %v781_v2 }
  0xf6   : > { %v834_v5 = vadd.f32 %v1794_v62, %v833_v3  ;;  %v1954_v6 = vpop.f32.mrf.mxu0 }
  0xf7   : > { %v1962_v7 = vpop.f32.mrf.mxu1  ;;  %v1102_v10 = vpack.c.bf16 %v782_v4, %v782_v4 }
  0xf8   : > { %v1103_v11 = vpack.c.bf16 %v834_v5, %v834_v5  ;;  %v784_v14 = vpop.f32.mrf.mxu0 }
  0xf9   : > { %v836_v15 = vpop.f32.mrf.mxu1  ;;  %v1201_v16 = vsel %vm1104_vm2, %v1102_v10, 0  ;;  %1999 = vmatmul.mubr.msk.bf16.vlgmr.msra.gmra.mxu0 %vm1104_vm2, %v1096_v8  ;;  %v1492_v8 = vld [vmem:[%s2608_s7] sm:$0xf] }
  0xfa   : > { %v1247_v17 = vsel %vm1104_vm2, %v1103_v11, 0  ;;  %2005 = vmatmul.mubr.msk.bf16.vlgmr.msra.gmra.mxu1 %vm1104_vm2, %v1097_v9  ;;  %v1955_v18 = vpop.f32.mrf.mxu0  ;;  %2009 = vmatpush3.bf16.xpose.msra.mxu0 %v1201_v16  ;;  %v1493_v9 = vld [vmem:[%s2608_s7 + $0x4] sm:$0xf] }
  0xfb   : > { %v1963_v19 = vpop.f32.mrf.mxu1  ;;  %2015 = vmatpush3.bf16.xpose.msra.mxu1 %v1247_v17  ;;  %2010 = vmatprep.mubr.msk.bf16.mxu0 %vm2196_vm0, %v2195_v1  ;;  %v1500_v18 = vsel %vm1306_vm3, %v1492_v8, 0 }
  0xfc   : > { %2016 = vmatprep.mubr.msk.bf16.mxu1 %vm2196_vm0, %v2195_v1  ;;  %2020 = vmatprep.subr.bf16.mxu0 %v2195_v1  ;;  %v1546_v19 = vsel %vm1306_vm3, %v1493_v9, 0 }
  0xfd   : > { %2026 = vmatprep.subr.bf16.mxu1 %v2195_v1  ;;  %v929_v25 = vpop.f32.mrf.mxu0 }
  0xfe   : > { %v930_v27 = vadd.f32 %v1807_v24, %v929_v25  ;;  %v1494_v24 = vld [vmem:[%s2608_s7 + $0x8] sm:$0xf]  ;;  %v1495_v25 = vld [vmem:[%s2608_s7 + $0xc] sm:$0xf] }
  0xff   : > { %v1970_v28 = vpop.f32.mrf.mxu0  ;;  %v981_v29 = vpop.f32.mrf.mxu1 }
 0x100   : > { %v1299_v30 = vpack.c.bf16 %v930_v27, %v930_v27  ;;  %v982_v31 = vadd.f32 %v1808_v26, %v981_v29 }
 0x101   : > { %2011 = vmatmul.mubr.msk.bf16.vlgmr.msra.gmra.mxu0 %vm1104_vm2, %v1098_v22  ;;  %v932_v32 = vpop.f32.mrf.mxu0  ;;  %v1978_v33 = vpop.f32.mrf.mxu1 }
 0x102   : > { %2017 = vmatmul.mubr.msk.bf16.vlgmr.msra.gmra.mxu1 %vm1104_vm2, %v1099_v23  ;;  %2022 = vmatprep.mubr.msk.bf16.mxu0 %vm2196_vm0, %v2195_v1  ;;  %v1308_v34 = vsel %vm1306_vm3, %v1299_v30, 0  ;;  %v1300_v35 = vpack.c.bf16 %v982_v31, %v982_v31  ;;  %v1592_v30 = vsel %vm1306_vm3, %v1494_v24, 0  ;;  %v1638_v31 = vsel %vm1306_vm3, %v1495_v25, 0 }
 0x103   : > { %2028 = vmatprep.mubr.msk.bf16.mxu1 %vm2196_vm0, %v2195_v1  ;;  %v1971_v36 = vpop.f32.mrf.mxu0  ;;  %v984_v37 = vpop.f32.mrf.mxu1  ;;  %2021 = vmatpush3.bf16.msra.mxu0 %v1308_v34 }
 0x104   : > { %v1354_v38 = vsel %vm1306_vm3, %v1300_v35, 0  ;;  %2032 = vmatprep.subr.bf16.mxu0 %v2195_v1 }
 0x105   : > { %v1979_v39 = vpop.f32.mrf.mxu1  ;;  %v1033_v40 = vpop.f32.mrf.mxu0  ;;  %2027 = vmatpush3.bf16.msra.mxu1 %v1354_v38 }
 0x106   : > { %2038 = vmatprep.subr.bf16.mxu1 %v2195_v1  ;;  %v1034_v53 = vadd.f32 %v1809_v49, %v1033_v40 }
 0x107   : > { %v1986_v41 = vpop.f32.mrf.mxu0  ;;  %v1085_v42 = vpop.f32.mrf.mxu1 }
 0x108   : > { %v1086_v54 = vadd.f32 %v1810_v50, %v1085_v42  ;;  %v1301_v55 = vpack.c.bf16 %v1034_v53, %v1034_v53 }
 0x109   : > { %v1036_v43 = vpop.f32.mrf.mxu0  ;;  %v1994_v44 = vpop.f32.mrf.mxu1 }
 0x10a   : > { %v1302_v56 = vpack.c.bf16 %v1086_v54, %v1086_v54  ;;  %v1400_v2 = vsel %vm1306_vm3, %v1301_v55, 0 }
 0x10b   : > { %v1987_v45 = vpop.f32.mrf.mxu0  ;;  %v1088_v46 = vpop.f32.mrf.mxu1 }
 0x10c   : > { %v1446_v3 = vsel %vm1306_vm3, %v1302_v56, 0 }
 0x10d   : > { %v1995_v47 = vpop.f32.mrf.mxu1 }
 0x1b9   : > { %v1145_v57 = vpop.f32.mrf.mxu0 }
 0x1ba   : > { %v1191_v58 = vpop.f32.mrf.mxu1  ;;  %v1291_v59 = vsel %vm1095_vm4, %v1145_v57, 0.0 }
 0x1bb   : > { %v1292_v60 = vsel %vm1095_vm4, %v1191_v58, 0.0  ;;  %v1295_v61 = vpack.c.bf16 %v1291_v59, %v1291_v59  ;;  %v2000_v63 = vpop.f32.mrf.mxu0 }
 0x1bc   : > { %v1296_v62 = vpack.c.bf16 %v1292_v60, %v1292_v60  ;;  %v2006_v0 = vpop.f32.mrf.mxu1 }
 0x1bd   : > { %v1148_v4 = vpop.f32.mrf.mxu0  ;;  %2023 = vmatmul.mubr.msk.bf16.vlgmr.msra.gmra.mxu0 %vm1104_vm2, %v1295_v61 }
 0x1be   : > { %v1194_v5 = vpop.f32.mrf.mxu1  ;;  %2029 = vmatmul.mubr.msk.bf16.vlgmr.msra.gmra.mxu1 %vm1104_vm2, %v1296_v62  ;;  %2033 = vmatpush3.bf16.msra.mxu0 %v1400_v2  ;;  %v1835_v2 = vld [vmem:[%s2609_s8] ss:$0 sm:$0xff] }
 0x1bf   : > { %2039 = vmatpush3.bf16.msra.mxu1 %v1446_v3  ;;  %v2001_v6 = vpop.f32.mrf.mxu0  ;;  %2034 = vmatprep.mubr.msk.bf16.mxu0 %vm2196_vm0, %v2195_v1 }
 0x1c0   : > { %v2007_v7 = vpop.f32.mrf.mxu1  ;;  %2040 = vmatprep.mubr.msk.bf16.mxu1 %vm2196_vm0, %v2195_v1  ;;  %2044 = vmatprep.subr.bf16.mxu0 %v2195_v1 }
 0x1c1   : > { %2050 = vmatprep.subr.bf16.mxu1 %v2195_v1  ;;  %v1237_v10 = vpop.f32.mrf.mxu0 }
 0x1c2   : > { %v1283_v11 = vpop.f32.mrf.mxu1  ;;  %v1293_v12 = vsel %vm1095_vm4, %v1237_v10, 0.0 }
 0x1c3   : > { %v1294_v13 = vsel %vm1095_vm4, %v1283_v11, 0.0  ;;  %v1297_v14 = vpack.c.bf16 %v1293_v12, %v1293_v12  ;;  %v2012_v16 = vpop.f32.mrf.mxu0 }
 0x1c4   : > { %v1298_v15 = vpack.c.bf16 %v1294_v13, %v1294_v13  ;;  %v2018_v17 = vpop.f32.mrf.mxu1 }
 0x1c5   : > { %v1240_v20 = vpop.f32.mrf.mxu0  ;;  %2035 = vmatmul.mubr.msk.bf16.vlgmr.msra.gmra.mxu0 %vm1104_vm2, %v1297_v14 }
 0x1c6   : > { %v1286_v21 = vpop.f32.mrf.mxu1  ;;  %2041 = vmatmul.mubr.msk.bf16.vlgmr.msra.gmra.mxu1 %vm1104_vm2, %v1298_v15  ;;  %2045 = vmatpush3.bf16.msra.mxu0 %v1500_v18 }
 0x1c7   : > { %2051 = vmatpush3.bf16.msra.mxu1 %v1546_v19  ;;  %v2013_v22 = vpop.f32.mrf.mxu0  ;;  %2046 = vmatprep.mubr.msk.bf16.mxu0 %vm2196_vm0, %v2195_v1 }
 0x1c8   : > { %v2019_v23 = vpop.f32.mrf.mxu1  ;;  %2052 = vmatprep.mubr.msk.bf16.mxu1 %vm2196_vm0, %v2195_v1  ;;  %2056 = vmatprep.subr.bf16.mxu0 %v2195_v1 }
 0x1c9   : > { %2062 = vmatprep.subr.bf16.mxu1 %v2195_v1 }
 0x27d   : > { %v1344_v26 = vpop.f32.mrf.mxu0 }
 0x27e   : > { %v1390_v27 = vpop.f32.mrf.mxu1  ;;  %v1488_v28 = vpack.c.bf16 %v1344_v26, %v1344_v26 }
 0x27f   : > { %v1489_v29 = vpack.c.bf16 %v1390_v27, %v1390_v27  ;;  %v2024_v32 = vpop.f32.mrf.mxu0 }
 0x280   : > { %v2030_v33 = vpop.f32.mrf.mxu1  ;;  %2047 = vmatmul.mubr.msk.bf16.vlgmr.msra.gmra.mxu0 %vm1104_vm2, %v1488_v28 }
 0x281   : > { %2053 = vmatmul.mubr.msk.bf16.vlgmr.msra.gmra.mxu1 %vm1104_vm2, %v1489_v29  ;;  %v1347_v34 = vpop.f32.mrf.mxu0  ;;  %2057 = vmatpush3.bf16.msra.mxu0 %v1592_v30 }
 0x282   : > { %v1393_v35 = vpop.f32.mrf.mxu1  ;;  %2063 = vmatpush3.bf16.msra.mxu1 %v1638_v31  ;;  %2058 = vmatprep.mubr.msk.bf16.mxu0 %vm2196_vm0, %v2195_v1 }
 0x283   : > { %2064 = vmatprep.mubr.msk.bf16.mxu1 %vm2196_vm0, %v2195_v1  ;;  %v2025_v36 = vpop.f32.mrf.mxu0 }
 0x284   : > { %v2031_v37 = vpop.f32.mrf.mxu1 }
 0x285   : > { %v1436_v38 = vpop.f32.mrf.mxu0 }
 0x286   : > { %v1482_v39 = vpop.f32.mrf.mxu1  ;;  %v1490_v40 = vpack.c.bf16 %v1436_v38, %v1436_v38 }
 0x287   : > { %v1491_v41 = vpack.c.bf16 %v1482_v39, %v1482_v39  ;;  %v2036_v42 = vpop.f32.mrf.mxu0 }
 0x288   : > { %v2042_v43 = vpop.f32.mrf.mxu1  ;;  %2059 = vmatmul.mubr.msk.bf16.vlgmr.msra.gmra.mxu0 %vm1104_vm2, %v1490_v40 }
 0x289   : > { %2065 = vmatmul.mubr.msk.bf16.vlgmr.msra.gmra.mxu1 %vm1104_vm2, %v1491_v41  ;;  %v1439_v44 = vpop.f32.mrf.mxu0 }
 0x28a   : > { %v1485_v45 = vpop.f32.mrf.mxu1 }
 0x28b   : > { %v2037_v46 = vpop.f32.mrf.mxu0 }
 0x28c   : > { %v2043_v47 = vpop.f32.mrf.mxu1 }
 0x340   : > { %v1536_v48 = vpop.f32.mrf.mxu0 }
 0x341   : > { %v1582_v49 = vpop.f32.mrf.mxu1  ;;  %v1680_v53 = vsel %vm387_vm1, %v1536_v48, 0.0 }
 0x342   : > { %v2048_v1 = vpop.f32.mrf.mxu0  ;;  %v1681_v54 = vsel %vm387_vm1, %v1582_v49, 0.0 }
 0x343   : > { %v2054_v50 = vpop.f32.mrf.mxu1  ;;  %v1682_v57 = vadd.f32 %v1681_v54, %v1680_v53 }
 0x344   : > { %v1539_v51 = vpop.f32.mrf.mxu0 }
 0x345   : > { %v1585_v52 = vpop.f32.mrf.mxu1 }
 0x346   : > { %v2049_v55 = vpop.f32.mrf.mxu0 }
 0x347   : > { %v2055_v56 = vpop.f32.mrf.mxu1 }
 0x348   : > { %v1628_v58 = vpop.f32.mrf.mxu0 }
 0x349   : > { %v1674_v59 = vpop.f32.mrf.mxu1  ;;  %v1683_v60 = vsel %vm387_vm1, %v1628_v58, 0.0 }
 0x34a   : > { %v1684_v61 = vadd.f32 %v1683_v60, %v1682_v57  ;;  %v2060_v62 = vpop.f32.mrf.mxu0  ;;  %v1685_v0 = vsel %vm387_vm1, %v1674_v59, 0.0 }
 0x34b   : > { %v2066_v63 = vpop.f32.mrf.mxu1 }
 0x34c   : > { %v1686_v3 = vadd.f32 %v1685_v0, %v1684_v61  ;;  %v1631_v4 = vpop.f32.mrf.mxu0 }
 0x34d   : > { %v1677_v5 = vpop.f32.mrf.mxu1 }
 0x34e   : > { %v1694_v6 = vadd.f32 %v1835_v2, %v1686_v3  ;;  %v2061_v7 = vpop.f32.mrf.mxu0 }
 0x34f   : > { %v2067_v8 = vpop.f32.mrf.mxu1 }
 0x350   : > { %1695 = vst.msk [vmem:[%s323_s27] sm:$0xff] %vm387_vm1, %v1694_v6 }
 0x351   : > { %2146 = shalt.err (!%p2143_p3)
}
 0x352   : > { %s2147_s25 = scalar_lea.hbm %s1708_s16, 128  ;;  %s2151_s27 = scalar_lea.hbm %s2610_s9, 256 }
 0x353   : > { %p2148_p4 = scmp.ne.s32.totalorder %s1708_s16, %s2147_s25  ;;  %p2152_p9 = scmp.lt.s32.totalorder %s1708_s16, %s2610_s9 }
 0x354   : > { %p2153_p10 = scmp.lt.s32.totalorder %s2151_s27, %s2147_s25 }
 0x355   : > { %p2149_p7 = pnand %p2148_p4, %p2286_p5 }
 0x356   : > { %p2154_p11 = por %p2153_p10, %p2152_p9 }
 0x357   : > { %p2150_p8 = pneg %p2149_p7 }
 0x359   : > { %p2155_p12 = pnand %p2154_p11, %p2150_p8 }
 0x35b   : > { %2158 = shalt.err (!%p2155_p12)
}
 0x35c   : > { %2068 = dma.vmem_to_hbm [thread:$0]  (%p2286_p5), %s1711_s28, 128, %s1708_s16, %s1697_s17  }
 0x35d PF: > { %p2074_p13 = scmp.ge.s32.totalorder %s2193_s12, 2  ;;  %s1722_s21 = sand.u32 1, %s2181_s30  }
 0x35e   : > { %s1723_s13 = scalar_lea.sflag [#allocation3], %s1722_s21 }
 0x35f   : > { %p2071_p0 = pnand %p2074_p13, %p2290_p6 }
 0x361   : > { %p2072_p1 = pneg %p2071_p0 }
 0x363   : > { %2176 = dma.done.wait (%p2072_p1), %s1723_s13, 128  }
 0x364   : > { %2178 = vsyncadd (%p2072_p1), %s1723_s13, 4294967168  ;;  %p19_p2 = scmp.ge.s32.totalorder %s2273_s15, 4   ;;  %s2613_s30 = smov %s2185_s10 }
 0x365   : > { %s2614_s10 = smov %s2189_s11  ;;  %s2615_s11 = smov %s2284_s18 }
 0x366   : > { %s2616_s12 = smov %s2273_s15  ;;  %21 = sbr.rel (!%p19_p2) target bundleno = 3 (0x3), region = 91 }
 0x36b   :  { %1728 = vsyncpa [#allocation3], 1 }
 0x36c   :  { %1730 = vsyncpa [#allocation3 + $0x1], 1 }

</bundles_post_ra>
